<compile_context>
chip_gen: v6e
topology: v6e:2x2x1
jax: 0.10.0
libtpu: 0.0.40
codegen_flags: <defaults>
</compile_context>

<pallas_src>
import jax
import jax.numpy as jnp
from jax import lax
from jax.experimental import pallas as pl
from jax.experimental.pallas import tpu as pltpu


def library_forward(x, w_t, w_theta, *, tile_n=2048, out_dtype=None):
    """Returns (time_derivs (N,1), thetas (N,M), norms (M,)) per Library.forward."""
    N, D = x.shape
    M = w_theta.shape[1]
    assert w_t.shape == (D, 1)
    W = M + 1  # fused weight width: [W_theta | W_t]
    out_dtype = jnp.dtype(x.dtype if out_dtype is None else out_dtype)

    # Pack weights once in the wrapper: thetas occupy lanes 0..M-1 (no lane
    # shift for the dominant output), the time-derivative column is lane M.
    w_fused = jnp.concatenate(
        [w_theta.astype(jnp.float32), w_t.astype(jnp.float32)], axis=1
    )  # (D, W)

    # Cap the tile to the (sublane-rounded) problem size; keep 8-row alignment.
    tile_n = int(max(8, min(tile_n, ((N + 7) // 8) * 8)))
    num_tiles = pl.cdiv(N, tile_n)

    def kernel(x_ref, w_ref, thetas_ref, td_ref, norms_ref, acc_ref):
        i = pl.program_id(0)

        @pl.when(i == 0)
        def _init():
            acc_ref[...] = jnp.zeros_like(acc_ref)

        # Single fused MXU pass: lanes 0..M-1 are thetas, lane M is time_deriv.
        fused = jnp.dot(x_ref[...], w_ref[...], preferred_element_type=jnp.float32)

        # Narrow stores; out-of-bounds rows of the ragged last tile are dropped.
        thetas_ref[...] = fused[:, :M].astype(thetas_ref.dtype)
        td_ref[...] = fused[:, M:M + 1].astype(td_ref.dtype)

        # Mask garbage rows (>= N) of the ragged last tile out of the norms.
        row = i * tile_n + lax.broadcasted_iota(jnp.int32, (tile_n, 1), 0)
        sq = jnp.where(row < N, fused * fused, 0.0)
        acc_ref[...] += jnp.sum(sq, axis=0, keepdims=True)

        @pl.when(i == pl.num_programs(0) - 1)
        def _finalize():
            acc = acc_ref[...]                       # (1, W) sum of squares
            td_ss = acc[:, M:M + 1]                  # ||time_derivs||_F^2
            # sqrt * rsqrt -> EUP slot; avoids a per-lane full-precision divide.
            norms_ref[...] = jnp.sqrt(td_ss) * lax.rsqrt(acc[:, :M])

    cost = pl.CostEstimate(
        flops=2 * N * D * W + 3 * N * W,
        transcendentals=2 * M,
        bytes_accessed=4 * (N * D + D * W + M) + N * W * out_dtype.itemsize,
    )

    thetas, time_derivs, norms2d = pl.pallas_call(
        kernel,
        out_shape=(
            jax.ShapeDtypeStruct((N, M), out_dtype),      # thetas
            jax.ShapeDtypeStruct((N, 1), out_dtype),      # time_derivs
            jax.ShapeDtypeStruct((1, M), jnp.float32),    # norms
        ),
        grid=(num_tiles,),
        in_specs=[
            pl.BlockSpec((tile_n, D), lambda i: (i, 0)),
            pl.BlockSpec((D, W), lambda i: (0, 0)),       # resident weights
        ],
        out_specs=(
            pl.BlockSpec((tile_n, M), lambda i: (i, 0)),
            pl.BlockSpec((tile_n, 1), lambda i: (i, 0)),
            pl.BlockSpec((1, M), lambda i: (0, 0)),       # written at last step
        ),
        scratch_shapes=[pltpu.VMEM((1, W), jnp.float32)],  # sum-of-squares acc
        compiler_params=pltpu.CompilerParams(
            # N axis carries the norm accumulator -> must stay sequential.
            dimension_semantics=("arbitrary",),
        ),
        cost_estimate=cost,
    )(x.astype(jnp.float32), w_fused)

    return time_derivs, thetas, norms2d[0]


if __name__ == "__main__":
    key = jax.random.PRNGKey(0)
    k_x, k_wt, k_wth = jax.random.split(key, 3)

    N, D, M = 64, 8, 16  # samples, input features, library terms

    x = jax.random.normal(k_x, (N, D), dtype=jnp.float32)
    # Deterministic synthetic "library" parameters (abstract in the base class).
    w_t = jax.random.normal(k_wt, (D, 1), dtype=jnp.float32)
    w_theta = jax.random.normal(k_wth, (D, M), dtype=jnp.float32)

    td, th, norms = library_forward(x, w_t, w_theta)
    jax.block_until_ready((td, th, norms))

    # Reference check in plain JAX.
    td_ref = x @ w_t
    th_ref = x @ w_theta
    norms_ref = jnp.squeeze(
        jnp.linalg.norm(td_ref) / jnp.linalg.norm(th_ref, axis=0, keepdims=True)
    )
    assert td.shape == (N, 1) and th.shape == (N, M) and norms.shape == (M,)
    assert jnp.allclose(td, td_ref, rtol=1e-5, atol=1e-5)
    assert jnp.allclose(th, th_ref, rtol=1e-5, atol=1e-5)
    assert jnp.allclose(norms, norms_ref, rtol=1e-4, atol=1e-5)

    print("KERNEL_OK")
</pallas_src>

<mosaic_0001>
module attributes {stable_mosaic.version = 11 : i64} {
  func.func @kernel(%arg0: i32, %arg1: memref<64x8xf32, #tpu.memory_space<vmem>>, %arg2: memref<8x17xf32, #tpu.memory_space<vmem>>, %arg3: memref<64x16xf32, #tpu.memory_space<vmem>>, %arg4: memref<64x1xf32, #tpu.memory_space<vmem>>, %arg5: memref<1x16xf32, #tpu.memory_space<vmem>>, %arg6: memref<1x17xf32, #tpu.memory_space<vmem>>) attributes {dimension_semantics = [#tpu.dimension_semantics<arbitrary>], iteration_bounds = array<i64: 1>, scalar_prefetch = 0 : i64, scratch_operands = 1 : i64, tpu.core_type = #tpu.core_type<tc>, window_params = [{transform_indices = @transform_0, window_bounds = array<i64: 64, 8>}, {pipeline_mode = #tpu.pipeline_mode<synchronous>, transform_indices = @transform_1, window_bounds = array<i64: 8, 17>}, {transform_indices = @transform_2, window_bounds = array<i64: 64, 16>}, {transform_indices = @transform_3, window_bounds = array<i64: 64, 1>}, {pipeline_mode = #tpu.pipeline_mode<synchronous>, transform_indices = @transform_4, window_bounds = array<i64: 1, 16>}]} {
    %c0_i32 = arith.constant 0 : i32
    %0 = arith.cmpi eq, %arg0, %c0_i32 : i32
    %1 = arith.extui %0 : i1 to i32
    %c0_i32_0 = arith.constant 0 : i32
    %2 = arith.cmpi ne, %1, %c0_i32_0 : i32
    scf.if %2 {
      %cst_17 = arith.constant 0.000000e+00 : f32
      %29 = vector.broadcast %cst_17 : f32 to vector<1x17xf32>
      %c0_18 = arith.constant 0 : index
      %c0_19 = arith.constant 0 : index
      %30 = vector.load %arg6[%c0_18, %c0_19] : memref<1x17xf32, #tpu.memory_space<vmem>>, vector<1x17xf32>
      tpu.vector_store %arg6[%c0_18, %c0_19], %29 {strides = array<i32>} : memref<1x17xf32, #tpu.memory_space<vmem>>, vector<1x17xf32>,
    } else {
    }
    %c0 = arith.constant 0 : index
    %c0_1 = arith.constant 0 : index
    %3 = vector.load %arg1[%c0, %c0_1] : memref<64x8xf32, #tpu.memory_space<vmem>>, vector<64x8xf32>
    %c0_2 = arith.constant 0 : index
    %c0_3 = arith.constant 0 : index
    %4 = vector.load %arg2[%c0_2, %c0_3] : memref<8x17xf32, #tpu.memory_space<vmem>>, vector<8x17xf32>
    %cst = arith.constant dense<0.000000e+00> : vector<64x17xf32>
    %5 = tpu.matmul %3, %4, %cst {dimension_numbers = #tpu.dot_dimension_numbers<[1], [0], [0], [1], [0, 0, 1, 1], [], []>} : vector<64x8xf32>, vector<8x17xf32>, vector<64x17xf32> -> vector<64x17xf32>
    %6 = vector.extract_strided_slice %5 {offsets = [0, 0], sizes = [64, 16], strides = [1, 1]} : vector<64x17xf32> to vector<64x16xf32>
    %c0_4 = arith.constant 0 : index
    %c0_5 = arith.constant 0 : index
    %7 = vector.load %arg3[%c0_4, %c0_5] : memref<64x16xf32, #tpu.memory_space<vmem>>, vector<64x16xf32>
    tpu.vector_store %arg3[%c0_4, %c0_5], %6 {strides = array<i32>} : memref<64x16xf32, #tpu.memory_space<vmem>>, vector<64x16xf32>,
    %8 = vector.extract_strided_slice %5 {offsets = [0, 16], sizes = [64, 1], strides = [1, 1]} : vector<64x17xf32> to vector<64x1xf32>
    %c0_6 = arith.constant 0 : index
    %c0_7 = arith.constant 0 : index
    %9 = vector.load %arg4[%c0_6, %c0_7] : memref<64x1xf32, #tpu.memory_space<vmem>>, vector<64x1xf32>
    tpu.vector_store %arg4[%c0_6, %c0_7], %8 {strides = array<i32>} : memref<64x1xf32, #tpu.memory_space<vmem>>, vector<64x1xf32>,
    %c64_i32 = arith.constant 64 : i32
    %10 = arith.muli %arg0, %c64_i32 : i32
    %11 = tpu.iota {dimensions = array<i32: 0>} : vector<64x1xi32>
    %12 = vector.broadcast %10 : i32 to vector<64x1xi32>
    %13 = arith.addi %12, %11 : vector<64x1xi32>
    %c64_i32_8 = arith.constant 64 : i32
    %14 = vector.broadcast %c64_i32_8 : i32 to vector<64x1xi32>
    %15 = arith.cmpi slt, %13, %14 : vector<64x1xi32>
    %16 = arith.mulf %5, %5 : vector<64x17xf32>
    %cst_9 = arith.constant 0.000000e+00 : f32
    %17 = vector.shape_cast %15 : vector<64x1xi1> to vector<64x1xi1>
    %18 = vector.broadcast %17 : vector<64x1xi1> to vector<64x17xi1>
    %19 = vector.broadcast %cst_9 : f32 to vector<64x17xf32>
    %20 = arith.select %18, %16, %19 : vector<64x17xi1>, vector<64x17xf32>
    %c0_10 = arith.constant 0 : index
    %c0_11 = arith.constant 0 : index
    %21 = vector.load %arg6[%c0_10, %c0_11] : memref<1x17xf32, #tpu.memory_space<vmem>>, vector<1x17xf32>
    %cst_12 = arith.constant dense<0.000000e+00> : vector<17xf32>
    %22 = vector.multi_reduction <add>, %20, %cst_12 [0] : vector<64x17xf32> to vector<17xf32>
    %23 = vector.shape_cast %22 : vector<17xf32> to vector<1x17xf32>
    %24 = arith.addf %21, %23 : vector<1x17xf32>
    %c0_13 = arith.constant 0 : index
    %c0_14 = arith.constant 0 : index
    %25 = vector.load %arg6[%c0_13, %c0_14] : memref<1x17xf32, #tpu.memory_space<vmem>>, vector<1x17xf32>
    tpu.vector_store %arg6[%c0_13, %c0_14], %24 {strides = array<i32>} : memref<1x17xf32, #tpu.memory_space<vmem>>, vector<1x17xf32>,
    %c0_i32_15 = arith.constant 0 : i32
    %26 = arith.cmpi eq, %arg0, %c0_i32_15 : i32
    %27 = arith.extui %26 : i1 to i32
    %c0_i32_16 = arith.constant 0 : i32
    %28 = arith.cmpi ne, %27, %c0_i32_16 : i32
    scf.if %28 {
      %c0_17 = arith.constant 0 : index
      %c0_18 = arith.constant 0 : index
      %29 = vector.load %arg6[%c0_17, %c0_18] : memref<1x17xf32, #tpu.memory_space<vmem>>, vector<1x17xf32>
      %30 = vector.extract_strided_slice %29 {offsets = [0, 16], sizes = [1, 1], strides = [1, 1]} : vector<1x17xf32> to vector<1x1xf32>
      %31 = math.sqrt %30 : vector<1x1xf32>
      %32 = vector.extract_strided_slice %29 {offsets = [0, 0], sizes = [1, 16], strides = [1, 1]} : vector<1x17xf32> to vector<1x16xf32>
      %33 = math.rsqrt %32 : vector<1x16xf32>
      %34 = vector.broadcast %31 : vector<1x1xf32> to vector<1x16xf32>
      %35 = arith.mulf %34, %33 : vector<1x16xf32>
      %c0_19 = arith.constant 0 : index
      %c0_20 = arith.constant 0 : index
      %36 = vector.load %arg5[%c0_19, %c0_20] : memref<1x16xf32, #tpu.memory_space<vmem>>, vector<1x16xf32>
      tpu.vector_store %arg5[%c0_19, %c0_20], %35 {strides = array<i32>} : memref<1x16xf32, #tpu.memory_space<vmem>>, vector<1x16xf32>,
    } else {
    }
    return
  }
  func.func @transform_0(%arg0: i32) -> (i32, i32) {
    %c0_i32 = arith.constant 0 : i32
    %c0_i32_0 = arith.constant 0 : i32
    return %arg0, %c0_i32 : i32, i32
  }
  func.func @transform_1(%arg0: i32) -> (i32, i32) {
    %c0_i32 = arith.constant 0 : i32
    %c0_i32_0 = arith.constant 0 : i32
    %c0_i32_1 = arith.constant 0 : i32
    return %c0_i32, %c0_i32_0 : i32, i32
  }
  func.func @transform_2(%arg0: i32) -> (i32, i32) {
    %c0_i32 = arith.constant 0 : i32
    %c0_i32_0 = arith.constant 0 : i32
    return %arg0, %c0_i32 : i32, i32
  }
  func.func @transform_3(%arg0: i32) -> (i32, i32) {
    %c0_i32 = arith.constant 0 : i32
    %c0_i32_0 = arith.constant 0 : i32
    return %arg0, %c0_i32 : i32, i32
  }
  func.func @transform_4(%arg0: i32) -> (i32, i32) {
    %c0_i32 = arith.constant 0 : i32
    %c0_i32_0 = arith.constant 0 : i32
    %c0_i32_1 = arith.constant 0 : i32
    return %c0_i32, %c0_i32_0 : i32, i32
  }
}

</mosaic_0001>

<bundles_post_ra>
// kernel: tpu_custom_call.1
= control target key start
LH: loop header
LB: loop body
LE: loop exit
PB: predicated region body
PF: predicated region fallthrough
CT: control target
= control target key end

     0   :  { %vm30_vm0 = vcmask 64512   ;;  %s552_s0 = inlined_call_operand.vmem [shape: f32[64,8], index: 0, kind: input, shape index: {}]   ;;  %s553_s1 = inlined_call_operand.vmem [shape: f32[8,17], index: 1, kind: input, shape index: {}]   ;;  %s554_s2 = inlined_call_operand.vmem [shape: f32[64,16], index: 2, kind: output, shape index: {0}]   ;;  %s555_s3 = inlined_call_operand.vmem [shape: f32[64,1], index: 3, kind: output, shape index: {1}]   ;;  %s556_s4 = inlined_call_operand.hbm [shape: f32[1,16], index: 4, kind: output, shape index: {2}]  }
   0x1   :  { %v29_v0 = vld [vmem:[%s553_s1] sm:$0xff]  ;;  %v22_v2 = vld [vmem:[%s552_s0 + $0x8] sm:$0xff]  ;;  %v23_v4 = vld [vmem:[%s552_s0 + $0x10] sm:$0xff] }
   0x2   :  { %v21_v1 = vld [vmem:[%s552_s0] sm:$0xff]  ;;  %358 = vmatprep.subr.mxu0 %v29_v0  ;;  %372 = vmatprep.subr.mxu1 %v29_v0  ;;  %v26_v5 = vld [vmem:[%s552_s0 + $0x28] sm:$0xff]  ;;  %v27_v6 = vld [vmem:[%s552_s0 + $0x30] sm:$0xff] }
   0x3   :  { %360 = vmatprep.mubr.msk.f32.mxu0 %vm30_vm0, %v21_v1  ;;  %v25_v3 = vld [vmem:[%s552_s0 + $0x20] sm:$0xff]  ;;  %359 = vmatpush3.msra.mxu0 %v29_v0 }
   0x4   :  { %361 = vmatmul.mubr.msk.f32.vlgmr.msra.gmra.mxu0 %vm30_vm0, %v22_v2  ;;  %373 = vmatpush3.msra.mxu1 %v29_v0 }
   0x5   :  { %10 = vsyncpa [#allocation4], 0  ;;  %366 = vmatprep.mubr.msk.f32.mxu1 %vm30_vm0, %v25_v3  ;;  %363 = vmatprep.mubr.msk.f32.mxu0 %vm30_vm0, %v23_v4  ;;  %v24_v7 = vld [vmem:[%s552_s0 + $0x18] sm:$0xff]  ;;  %vm19_vm1 = vcmask 131072   ;;  %v403_v9 = vmov 0.0   ;;  %v404_v10 = vmov 16   ;;  %v312_v62 = vlaneseq }
   0x6   :  { %367 = vmatmul.mubr.msk.f32.vlgmr.msra.gmra.mxu1 %vm30_vm0, %v26_v5  ;;  %v28_v8 = vld [vmem:[%s552_s0 + $0x38] sm:$0xff]  ;;  %20 = vst.msk [vmem:[#allocation2] sm:$0x1] %vm19_vm1, %v403_v9  ;;  %378 = vset.pattern.permute.xlu0 %v404_v10  ;;  %vm160_vm2 = vcmask 130048   ;;  %s405_s8 = smov 112   ;;  %vm270_vm3 = vcmask 138240  }
   0x7   :  { %369 = vmatprep.mubr.msk.f32.mxu1 %vm30_vm0, %v27_v6  ;;  %vm201_vm6 = vcmask 7168   ;;  %v313_v63 = vshrl.u32 %v312_v62, 7  ;;  %s406_s6 = smov [#allocation3]   ;;  %vm317_vm7 = vcmask 122880  }
   0x8   :  { %364 = vmatmul.mubr.msk.f32.gmra.mxu0 %vm30_vm0, %v24_v7  ;;  %s329_s7 = sshll.u32 %s406_s6, 4  ;;  %s330_s7 = int_to_ptr.vmem [resolvable:$true] %s329_s7 }
   0x9   :  { %v314_v0 = vsub.s32 0, %v313_v63  ;;  %s381_s9 = scalar_lea.vmem %s330_s7, 16  ;;  %s385_s10 = scalar_lea.vmem %s330_s7, 32 }
   0xa   :  { %370 = vmatmul.mubr.msk.f32.gmra.mxu1 %vm30_vm0, %v28_v8  ;;  %p382_p0 = scmp.ne.s32.totalorder %s330_s7, %s381_s9  ;;  %p386_p1 = scmp.lt.s32.totalorder %s330_s7, %s330_s7 }
   0xb   :  { %p387_p2 = scmp.lt.s32.totalorder %s385_s10, %s381_s9 }
   0xd   :  { %v269_v47 = vld [vmem:[#allocation2] sm:$0x1]  ;;  %p388_p3 = por %p387_p2, %p386_p1 }
   0xf   :  { %p389_p4 = pnand %p388_p3, %p382_p0 }
  0xc4   :  { %v362_v11 = vpop.f32.mrf.mxu0 }
  0xc5   :  { %162 = vst.msk [vmem:[%s554_s2 + $0x8] sm:$0xff] %vm160_vm2, %v362_v11  ;;  %179 = vrot.lane.b32.xlu1 %v362_v11, %s405_s8  ;;  %v238_v14 = vmul.f32 %v362_v11, %v362_v11 }
  0xc6   :  { %v121_v12 = vpop.f32.mrf.mxu0  ;;  %v368_v13 = vpop.f32.mrf.mxu1 }
  0xc7   :  { %161 = vst.msk [vmem:[%s554_s2] sm:$0xff] %vm160_vm2, %v121_v12  ;;  %v237_v15 = vmul.f32 %v121_v12, %v121_v12  ;;  %166 = vst.msk [vmem:[%s554_s2 + $0x28] sm:$0xff] %vm160_vm2, %v368_v13  ;;  %177 = vrot.lane.b32.xlu0 %v121_v12, %s405_s8  ;;  %v272_v21 = vsel %vm270_vm3, %v238_v14, 0.0  ;;  %v242_v29 = vmul.f32 %v368_v13, %v368_v13 }
  0xc8   :  { %v365_v16 = vpop.f32.mrf.mxu0  ;;  %v141_v17 = vpop.f32.mrf.mxu1 }
  0xc9   :  { %v271_v18 = vsel %vm270_vm3, %v237_v15, 0.0  ;;  %164 = vst.msk [vmem:[%s554_s2 + $0x18] sm:$0xff] %vm160_vm2, %v365_v16  ;;  %165 = vst.msk [vmem:[%s554_s2 + $0x20] sm:$0xff] %vm160_vm2, %v141_v17  ;;  %185 = vrot.lane.b32.xlu1 %v141_v17, %s405_s8  ;;  %v240_v22 = vmul.f32 %v365_v16, %v365_v16  ;;  %v241_v26 = vmul.f32 %v141_v17, %v141_v17  ;;  %v280_v35 = vsel %vm270_vm3, %v242_v29, 0.0 }
  0xca   :  { %v131_v19 = vpop.f32.mrf.mxu0  ;;  %v371_v20 = vpop.f32.mrf.mxu1  ;;  %v273_v24 = vadd.f32 %v272_v21, %v271_v18 }
  0xcb   :  { %163 = vst.msk [vmem:[%s554_s2 + $0x10] sm:$0xff] %vm160_vm2, %v131_v19  ;;  %v239_v23 = vmul.f32 %v131_v19, %v131_v19  ;;  %183 = vrot.lane.b32.xlu0 %v365_v16, %s405_s8  ;;  %168 = vst.msk [vmem:[%s554_s2 + $0x38] sm:$0xff] %vm160_vm2, %v371_v20  ;;  %v276_v30 = vsel %vm270_vm3, %v240_v22, 0.0  ;;  %v278_v32 = vsel %vm270_vm3, %v241_v26, 0.0  ;;  %v244_v36 = vmul.f32 %v371_v20, %v371_v20 }
  0xcc   :  { %v151_v25 = vpop.f32.mrf.mxu1 }
  0xcd   :  { %v274_v27 = vsel %vm270_vm3, %v239_v23, 0.0  ;;  %181 = vrot.lane.b32.xlu1 %v131_v19, %s405_s8  ;;  %167 = vst.msk [vmem:[%s554_s2 + $0x30] sm:$0xff] %vm160_vm2, %v151_v25  ;;  %v243_v33 = vmul.f32 %v151_v25, %v151_v25  ;;  %v284_v40 = vsel %vm270_vm3, %v244_v36, 0.0 }
  0xce   :  { %v275_v28 = vadd.f32 %v274_v27, %v273_v24 }
  0xcf   :  { %v282_v38 = vsel %vm270_vm3, %v243_v33, 0.0 }
  0xd0   :  { %v277_v31 = vadd.f32 %v276_v30, %v275_v28 }
  0xd1   :  { %189 = vrot.lane.b32.xlu1 %v151_v25, %s405_s8 }
  0xd2   :  { %v279_v34 = vadd.f32 %v278_v32, %v277_v31 }
  0xd4   :  { %v281_v37 = vadd.f32 %v280_v35, %v279_v34 }
  0xd6   :  { %v283_v39 = vadd.f32 %v282_v38, %v281_v37 }
  0xd8   :  { %v285_v41 = vadd.f32 %v284_v40, %v283_v39 }
  0xda   :  { %v286_v42 = vrot.slane %v285_v41, 4 }
  0xdc   :  { %v287_v43 = vadd.f32 %v286_v42, %v285_v41 }
  0xde   :  { %v288_v44 = vrot.slane %v287_v43, 2 }
  0xe0   :  { %v289_v45 = vadd.f32 %v288_v44, %v287_v43 }
  0xe2   :  { %v290_v46 = vrot.slane %v289_v45, 1 }
  0xe4   :  { %v291_v48 = vadd.f32 %v290_v46, %v289_v45 }
  0xe6   :  { %v292_v49 = vadd.f32 %v291_v48, %v269_v47 }
  0xe8   :  { %294 = vst.msk [vmem:[#allocation2] sm:$0x1] %vm19_vm1, %v292_v49 }
  0xef   :  { %v298_v50 = vld [vmem:[#allocation2] sm:$0x1] }
  0xf0   :  { %379 = vrsqrt.f32 %v298_v50  ;;  %vm301_vm4 = vcmp.eq.f32.partialorder %v298_v50, inf  ;;  %v304_v53 = vand.u32 2147483648, %v298_v50  ;;  %vm303_vm5 = vcmp.eq.f32.partialorder %v298_v50, 0.0 }
  0xfd   :  { %v380_v51 = vpop.eup %379 }
  0xfe   :  { %v300_v52 = vmul.f32 %v380_v51, %v298_v50 }
 0x100   :  { %v302_v54 = vsel %vm301_vm4, %v298_v50, %v300_v52 }
 0x101   :  { %v305_v55 = vsel %vm303_vm5, %v304_v53, %v302_v54 }
 0x102   :  { %309 = vperm.xlu0 %378, %v305_v55  }
 0x106   :  { %187 = vrot.lane.b32.xlu0 %v368_v13, %s405_s8 }
 0x10a   :  { %191 = vrot.lane.b32.xlu0 %v371_v20, %s405_s8 }
 0x137   :  { %v180_v56 = vpop.permute.xlu1 %179 }
 0x138   :  { %203 = vst.msk [vmem:[%s555_s3 + $0x8] sm:$0xff] %vm201_vm6, %v180_v56 }
 0x139   :  { %v178_v57 = vpop.permute.xlu0 %177 }
 0x13a   :  { %202 = vst.msk [vmem:[%s555_s3] sm:$0xff] %vm201_vm6, %v178_v57 }
 0x13b   :  { %v186_v58 = vpop.permute.xlu1 %185 }
 0x13c   :  { %206 = vst.msk [vmem:[%s555_s3 + $0x20] sm:$0xff] %vm201_vm6, %v186_v58 }
 0x13d   :  { %v184_v59 = vpop.permute.xlu0 %183 }
 0x13e   :  { %205 = vst.msk [vmem:[%s555_s3 + $0x18] sm:$0xff] %vm201_vm6, %v184_v59 }
 0x13f   :  { %v182_v60 = vpop.permute.xlu1 %181 }
 0x140   :  { %204 = vst.msk [vmem:[%s555_s3 + $0x10] sm:$0xff] %vm201_vm6, %v182_v60 }
 0x143   :  { %v190_v61 = vpop.permute.xlu1 %189 }
 0x144   :  { %208 = vst.msk [vmem:[%s555_s3 + $0x30] sm:$0xff] %vm201_vm6, %v190_v61 }
 0x17d   :  { %v310_v1 = vpop.permute.xlu0 %309 }
 0x17e   :  { %v315_v2 = vrot.slane %v310_v1, %v314_v0 }
 0x180   :  { %v316_v3 = vmul.f32 %v380_v51, %v315_v2 }
 0x181   :  { %v188_v4 = vpop.permute.xlu0 %187 }
 0x182   :  { %207 = vst.msk [vmem:[%s555_s3 + $0x28] sm:$0xff] %vm201_vm6, %v188_v4 }
 0x183   :  { %318 = vst.msk [vmem:[#allocation3] sm:$0x1] %vm317_vm7, %v316_v3 }
 0x184   :  { %392 = shalt.err (!%p389_p4)
}
 0x185   :  { %332 = dma.vmem_to_hbm [thread:$0]  %s330_s7, 16, %s556_s4, [#allocation4]   ;;  %v192_v5 = vpop.permute.xlu0 %191 }
 0x186   :  { %209 = vst.msk [vmem:[%s555_s3 + $0x38] sm:$0xff] %vm201_vm6, %v192_v5 }
 0x187   :  { %401 = dma.done.wait [#allocation4], 16  }
 0x188   :  { %402 = vsyncadd [#allocation4], 4294967280 }
 0x189   :  { %340 = vsyncpa [#allocation4], 1 }

</bundles_post_ra>
